<compile_context>
chip_gen: v5e
topology: v5e:2x2
jax: 0.10.0
libtpu: 0.0.40
codegen_flags: <defaults>
</compile_context>

<pallas_src>
import jax
import jax.numpy as jnp
import numpy as np
from jax.experimental import pallas as pl
from jax.experimental.pallas import tpu as pltpu


def _laplacian_dp_kernel(x_ref, noise_ref, o_ref):
    # x_ref:     (TM, D) tile of embeddings
    # noise_ref: (1, D)  laplace noise row (resident, same for every grid step)
    # o_ref:     (TM, D) output tile
    o_ref[...] = x_ref[...] + noise_ref[...]  # (1, D) broadcasts over sublanes


def _pick_row_tile(n_rows, row_bytes):
    """Largest power-of-two row tile (>= 8 sublanes) such that the
    double-buffered input + output tiles (4 buffers total) stay well under the
    scoped-VMEM default on every TPU generation (v7x: 64 MiB physical, 32 MiB
    default scoped), while keeping >= 2 grid steps so v7x's second TensorCore
    is not left idle."""
    vmem_budget = 16 * 1024 * 1024  # conservative: fits default scoped VMEM everywhere
    tm = 2048
    while tm > 8 and 4 * tm * row_bytes > vmem_budget:
        tm //= 2
    while tm > 8 and 2 * tm > n_rows:   # keep >= 2 grid steps when batch allows
        tm //= 2
    return max(tm, 8)


def laplacian_dp(embs, noise, *, tm=None, in_place=False):
    """embs: (N, D), noise: (D,)  ->  embs + noise[None, :] (same dtype as embs)."""
    N, D = embs.shape
    if tm is None:
        tm = _pick_row_tile(N, D * embs.dtype.itemsize)
    noise2d = noise.reshape(1, D).astype(embs.dtype)

    kwargs = {}
    if in_place:
        # Write into the embs buffer; caller should donate `embs` (jit
        # donate_argnums) for a true alias, otherwise XLA inserts a copy.
        kwargs["input_output_aliases"] = {0: 0}

    return pl.pallas_call(
        _laplacian_dp_kernel,
        out_shape=jax.ShapeDtypeStruct((N, D), embs.dtype),
        grid_spec=pl.GridSpec(
            grid=(pl.cdiv(N, tm),),              # ragged tail handled by Pallas masking
            in_specs=[
                pl.BlockSpec((tm, D), lambda i: (i, 0)),   # embeddings tile
                pl.BlockSpec((1, D), lambda i: (0, 0)),    # shared noise row (resident)
            ],
            out_specs=pl.BlockSpec((tm, D), lambda i: (i, 0)),
        ),
        compiler_params=pltpu.CompilerParams(
            dimension_semantics=("parallel",),   # sharded across TCs on v7x
        ),
        **kwargs,
    )(embs, noise2d)


class LaplacianDPJax:
    """JAX/Pallas port of the PyTorch LaplacianDP module."""

    def __init__(self, eps, embs_dim=300, C=0.005):
        self.embs_dim = embs_dim
        d = 2 * C * np.sqrt(embs_dim)
        alpha = eps / d
        self.scale = 1.0 / alpha

    def __call__(self, embs, key):
        # Stand-in for np.random.laplace(0, scale, embs_dim); same distribution,
        # different RNG stream. Noise is generated in f32 (DP tail precision)
        # and cast to the embedding dtype at the add boundary.
        noise = jax.random.laplace(key, (self.embs_dim,), dtype=jnp.float32) * self.scale
        return laplacian_dp(embs, noise)
        # TODO(synk): for end-to-end perf, fuse this add into the producer of
        # `embs` (or generate the noise in-kernel via pltpu.prng_*) instead of a
        # standalone HBM round trip.


if __name__ == "__main__":
    key = jax.random.PRNGKey(0)
    k_x, k_noise = jax.random.split(key)

    batch, embs_dim = 16, 128
    eps = 1.0

    embs = jax.random.normal(k_x, (batch, embs_dim), dtype=jnp.float32)

    module = LaplacianDPJax(eps=eps, embs_dim=embs_dim)
    out = module(embs, k_noise)
    out = jax.block_until_ready(out)

    # Reference check: plain JAX broadcast add with the same noise.
    noise_ref = (jax.random.laplace(k_noise, (embs_dim,), dtype=jnp.float32)
                 * module.scale).astype(embs.dtype)
    expected = embs + noise_ref[None, :]
    np.testing.assert_allclose(np.asarray(out), np.asarray(expected), rtol=1e-6, atol=1e-6)

    print("KERNEL_OK")
</pallas_src>

<mosaic_0001>
module attributes {stable_mosaic.version = 11 : i64} {
  func.func @_laplacian_dp_kernel(%arg0: i32, %arg1: memref<8x128xf32, #tpu.memory_space<vmem>>, %arg2: memref<1x128xf32, #tpu.memory_space<vmem>>, %arg3: memref<8x128xf32, #tpu.memory_space<vmem>>) attributes {dimension_semantics = [#tpu.dimension_semantics<parallel>], iteration_bounds = array<i64: 2>, scalar_prefetch = 0 : i64, scratch_operands = 0 : i64, tpu.core_type = #tpu.core_type<tc>, window_params = [{transform_indices = @transform_0, window_bounds = array<i64: 8, 128>}, {pipeline_mode = #tpu.pipeline_mode<synchronous>, transform_indices = @transform_1, window_bounds = array<i64: 1, 128>}, {transform_indices = @transform_2, window_bounds = array<i64: 8, 128>}]} {
    %c0 = arith.constant 0 : index
    %c0_0 = arith.constant 0 : index
    %0 = vector.load %arg1[%c0, %c0_0] : memref<8x128xf32, #tpu.memory_space<vmem>>, vector<8x128xf32>
    %c0_1 = arith.constant 0 : index
    %c0_2 = arith.constant 0 : index
    %1 = vector.load %arg2[%c0_1, %c0_2] : memref<1x128xf32, #tpu.memory_space<vmem>>, vector<1x128xf32>
    %2 = vector.broadcast %1 : vector<1x128xf32> to vector<8x128xf32>
    %3 = arith.addf %0, %2 : vector<8x128xf32>
    %c0_3 = arith.constant 0 : index
    %c0_4 = arith.constant 0 : index
    %4 = vector.load %arg3[%c0_3, %c0_4] : memref<8x128xf32, #tpu.memory_space<vmem>>, vector<8x128xf32>
    tpu.vector_store %arg3[%c0_3, %c0_4], %3 {strides = array<i32>} : memref<8x128xf32, #tpu.memory_space<vmem>>, vector<8x128xf32>,
    return
  }
  func.func @transform_0(%arg0: i32) -> (i32, i32) {
    %c0_i32 = arith.constant 0 : i32
    %c0_i32_0 = arith.constant 0 : i32
    return %arg0, %c0_i32 : i32, i32
  }
  func.func @transform_1(%arg0: i32) -> (i32, i32) {
    %c0_i32 = arith.constant 0 : i32
    %c0_i32_0 = arith.constant 0 : i32
    %c0_i32_1 = arith.constant 0 : i32
    return %c0_i32, %c0_i32_0 : i32, i32
  }
  func.func @transform_2(%arg0: i32) -> (i32, i32) {
    %c0_i32 = arith.constant 0 : i32
    %c0_i32_0 = arith.constant 0 : i32
    return %arg0, %c0_i32 : i32, i32
  }
}

</mosaic_0001>

<bundles_post_ra>
// kernel: tpu_custom_call.1
= control target key start
LH: loop header
LB: loop body
LE: loop exit
PB: predicated region body
PF: predicated region fallthrough
CT: control target
= control target key end

     0   :  { %7 = vsyncpa [#allocation3], 0  ;;  %s637_s0 = inlined_call_operand.hbm [shape: f32[16,128], index: 0, kind: input, shape index: {}]   ;;  %s638_s1 = inlined_call_operand.hbm [shape: f32[1,128], index: 1, kind: input, shape index: {}]   ;;  %s639_s2 = inlined_call_operand.hbm [shape: f32[16,128], index: 2, kind: output, shape index: {}]  }
   0x1   :  { %9 = vsyncpa [#allocation3 + $0x1], 0 }
   0x2   :  { %10 = vsyncpa [#allocation6], 0 }
   0x3   :  { %11 = vsyncpa [#allocation4], 0 }
   0x4   :  { %13 = vsyncpa [#allocation4 + $0x1], 0  ;;  %s499_s9 = smov 0   ;;  %s501_s10 = smov 0  }
   0x5   :  { %s503_s11 = smov 0   ;;  %s505_s12 = smov 0  }
   0x6 LB: > { %s520_s13 = sadd.s32 4294967295, %s481_s12   ;;  %s279_s14 = sadd.s32 4294967294, %s481_s12   ;;  %s481_s12 = sphi %s505_s12, %s649_s12   ;;  %s477_s11 = sphi %s503_s11, %s648_s11   ;;  %s473_s10 = sphi %s501_s10, %s647_s10   ;;  %s469_s9 = sphi %s499_s9, %s646_s9  }
   0x7   : > { %p39_p0 = scmp.ne.s32.totalorder %s473_s10, %s469_s9  ;;  %p40_p1 = scmp.eq.s32.totalorder %s520_s13, 0 }
   0x8   : > { %p84_p2 = scmp.eq.s32.totalorder %s520_s13, 1  ;;  %p90_p3 = scmp.eq.s32.totalorder %s279_s14, 1 }
   0x9   : > { %p529_p4 = por %p40_p1, %p39_p0  ;;  %p280_p5 = scmp.ge.s32.totalorder %s481_s12, 1 }
   0xa   : > { %p534_p6 = por %p90_p3, %p39_p0  ;;  %p97_p7 = scmp.lt.s32.totalorder %s481_s12, 3 }
   0xb   : > { %s109_s19 = sshll.u32 %s638_s1, 4  ;;  %s483_s21 = smov [#allocation5]   ;;  %s110_s19 = int_to_ptr.hbm [resolvable:$true] %s109_s19 }
   0xc   : > { %p542_p8 = pnand %p280_p5, %p97_p7  ;;  %s111_s22 = sshll.u32 %s483_s21, 4  ;;  %s112_s22 = int_to_ptr.vmem [resolvable:$true] %s111_s22 }
   0xd   : > { %s552_s23 = sadd.s32 1, %s481_s12   ;;  %s26_s24 = sadd.s32 1, %s477_s11 }
   0xe   : > { %p301_p10 = pneg %p542_p8  ;;  %s23_s25 = ssub.s32 %s481_s12, %s552_s23 }
   0xf   : > { %p24_p12 = scmp.eq.s32.totalorder %s23_s25, 0  ;;  %p33_p13 = scmp.ne.s32.totalorder %s477_s11, %s473_s10 }
  0x10   : > { %p302_p11 = pnand %p301_p10, %p40_p1  ;;  %p34_p0 = scmp.eq.s32.totalorder %s481_s12, 0 }
  0x11   : > { %s561_s26 = scalar_select %p24_p12, %s477_s11, %s26_s24  }
  0x12   : > { %304 = dma.hbm_to_vmem [thread:$0]  (!%p302_p11), %s110_s19, 16, %s112_s22, [#allocation6]  }
  0x13   : > { %p565_p3 = por %p84_p2, %p33_p13  ;;  %p314_p5 = scmp.lt.s32.totalorder %s481_s12, 2 }
  0x14   : > { %s122_s28 = sand.u32 1, %s477_s11   ;;  %s284_s29 = sshll.u32 %s481_s12, 3 }
  0x15   : > { %p35_p7 = por %p34_p0, %p33_p13  ;;  %s283_s30 = sshll.u32 %s122_s28, 3 }
  0x16   : > { %s130_s5 = scalar_lea.hbm %s637_s0, %s284_s29  ;;  %s126_s7 = scalar_lea.vmem [#allocation2], %s283_s30 }
  0x17   : > { %s132_s6 = sshll.u32 %s130_s5, 4  ;;  %s134_s8 = sshll.u32 %s126_s7, 4  ;;  %s133_s6 = int_to_ptr.hbm [resolvable:$true] %s132_s6  ;;  %s135_s8 = int_to_ptr.vmem [resolvable:$true] %s134_s8 }
  0x18   : > { %p575_p10 = pnand %p314_p5, %p35_p7  ;;  %s123_s17 = scalar_lea.sflag [#allocation3], %s122_s28 }
  0x19   : > { %s381_s18 = sshra.s32 %s133_s6, 4  ;;  %s388_s24 = scalar_lea.hbm %s637_s0, 16  ;;  %s382_s18 = int_to_ptr.hbm [resolvable:$true] %s381_s18 }
  0x1a   : > { %s383_s19 = scalar_lea.hbm %s382_s18, 8  ;;  %p385_p11 = pneg %p575_p10 }
  0x1b   : > { %p384_p2 = scmp.ne.s32.totalorder %s382_s18, %s383_s19  ;;  %p389_p0 = scmp.lt.s32.totalorder %s382_s18, %s637_s0 }
  0x1c   : > { %p390_p5 = scmp.lt.s32.totalorder %s388_s24, %s383_s19 }
  0x1d   : > { %p386_p12 = pnand %p385_p11, %p384_p2 }
  0x1e   : > { %p391_p7 = por %p390_p5, %p389_p0 }
  0x1f   : > { %p387_p13 = pneg %p386_p12 }
  0x21   : > { %p392_p9 = pnand %p391_p7, %p387_p13 }
  0x23   : > { %395 = shalt.err (!%p392_p9)
}
  0x24   : > { %308 = dma.hbm_to_vmem [thread:$0]  (!%p575_p10), %s133_s6, 128, %s135_s8, %s123_s17  }
  0x25   : > { %143 = sbr.rel (%p542_p8) target bundleno = 60 (0x3c), region = 28  ;;  %s592_s28 = sand.u32 (!%p542_p8), 1, %s473_s10  }
  0x26   : > { %s286_s30 = sshll.u32 (!%p542_p8), %s592_s28, 3  ;;  %s146_s3 = scalar_lea.sflag (!%p542_p8), [#allocation3], %s592_s28 }
  0x27   : > { %s149_s4 = scalar_lea.vmem (!%p542_p8), [#allocation2], %s286_s30 }
  0x2a   : > { %456 = dma.done.wait (%p529_p4), %s146_s3, 128  }
  0x2b   : > { %458 = vsyncadd (%p529_p4), %s146_s3, 4294967168 }
  0x2c   : > { %460 = dma.done.wait (%p40_p1), [#allocation6], 16  }
  0x2d   : > { %462 = vsyncadd (%p40_p1), [#allocation6], 4294967280  ;;  %s290_s20 = sshll.u32 %s520_s13, 3  ;;  %s175_s8 = scalar_lea.vmem [#allocation7], %s286_s30  ;;  %v176_v0 = vld [vmem:[%s149_s4] sm:$0xff] }
  0x2e   : > { %s194_s7 = scalar_lea.hbm %s639_s2, %s290_s20  ;;  %s196_s14 = sshll.u32 %s175_s8, 4  ;;  %v350_v1 = vld [vmem:[#allocation5] ss:$0 sm:$0xff]  ;;  %s197_s14 = int_to_ptr.vmem [resolvable:$true] %s196_s14 }
  0x2f   : > { %s198_s17 = sshll.u32 %s194_s7, 4  ;;  %v181_v2 = vadd.f32 %v350_v1, %v176_v0  ;;  %s184_s15 = scalar_lea.sflag [#allocation4], %s592_s28  ;;  %s199_s17 = int_to_ptr.hbm [resolvable:$true] %s198_s17 }
  0x30   : > { %s425_s18 = sshra.s32 %s199_s17, 4  ;;  %s431_s22 = scalar_lea.hbm %s639_s2, 16  ;;  %s426_s18 = int_to_ptr.hbm [resolvable:$true] %s425_s18 }
  0x31   : > { %182 = vst [vmem:[%s175_s8] sm:$0xff] %v181_v2  ;;  %s427_s19 = scalar_lea.hbm %s426_s18, 8  ;;  %p432_p9 = scmp.lt.s32.totalorder %s426_s18, %s639_s2 }
  0x32   : > { %p428_p1 = scmp.ne.s32.totalorder %s426_s18, %s427_s19  ;;  %p433_p10 = scmp.lt.s32.totalorder %s431_s22, %s427_s19 }
  0x34   : > { %p429_p4 = pnand %p428_p1, %p565_p3  ;;  %p434_p2 = por %p433_p10, %p432_p9 }
  0x36   : > { %p430_p8 = pneg %p429_p4 }
  0x38   : > { %p435_p11 = pnand %p434_p2, %p430_p8 }
  0x3a   : > { %438 = shalt.err (!%p435_p11)
}
  0x3b   : > { %299 = dma.vmem_to_hbm [thread:$0]  (%p565_p3), %s197_s14, 128, %s199_s17, %s184_s15  }
  0x3c PF: > { %s210_s29 = sand.u32 1, %s469_s9   ;;  %p645_p12 = scmp.ge.s32.totalorder %s481_s12, 2 }
  0x3d   : > { %s211_s28 = scalar_lea.sflag [#allocation4], %s210_s29 }
  0x3e   : > { %p310_p13 = pnand %p645_p12, %p534_p6 }
  0x40   : > { %p311_p0 = pneg %p310_p13 }
  0x42   : > { %464 = dma.done.wait (%p311_p0), %s211_s28, 128  }
  0x43   : > { %466 = vsyncadd (%p311_p0), %s211_s28, 4294967168  ;;  %p16_p5 = scmp.ge.s32.totalorder %s552_s23, 4   ;;  %s646_s9 = smov %s473_s10 }
  0x44   : > { %s647_s10 = smov %s477_s11  ;;  %s648_s11 = smov %s561_s26 }
  0x45   : > { %s649_s12 = smov %s552_s23  ;;  %18 = sbr.rel (!%p16_p5) target bundleno = 6 (0x6), region = 77 }
  0x4a   :  { %217 = vsyncpa [#allocation3], 1 }
  0x4b   :  { %219 = vsyncpa [#allocation3 + $0x1], 1 }
  0x4c   :  { %220 = vsyncpa [#allocation6], 1 }
  0x4d   :  { %221 = vsyncpa [#allocation4], 1 }
  0x4e   :  { %223 = vsyncpa [#allocation4 + $0x1], 1 }

</bundles_post_ra>
